<compile_context>
chip_gen: v7x
topology: tpu7x:2x2x1
jax: 0.10.0
libtpu: 0.0.40
codegen_flags: <defaults>
</compile_context>

<pallas_src>
import jax
import jax.numpy as jnp
from jax.experimental import pallas as pl
from jax.experimental.pallas import tpu as pltpu


def rgbd_in_kernel(x_ref, w_ref, b_ref, alpha_ref, o_ref):
    # x_ref:     (TB, D) f32  -- flattened rgbd rows (affine already folded)
    # w_ref:     (D, K)  bf16 -- folded weight  W' = 2*W
    # b_ref:     (1, K)  f32  -- folded bias    b' = b - sum(W, axis=0)
    # alpha_ref: (1,)    f32 in SMEM -- shared PReLU slope
    y = jnp.dot(x_ref[...], w_ref[...].astype(jnp.float32),
                preferred_element_type=jnp.float32)
    y = y + b_ref[...]                                 # broadcast (1, K)
    alpha = alpha_ref[0]
    o_ref[...] = jnp.where(y >= 0.0, y, alpha * y)     # PReLU (single bulk store)


def rgbd_in_forward(rgbd, w, b, alpha, *, max_tile_b=512):
    """rgbd: (E, S, C, H, W) float in [0,1]; w: (D, K); b: (K,); alpha: (1,).
    Returns (E, S, K) float32."""
    E, S, C, H, W = rgbd.shape
    B = E * S
    D = C * H * W
    K = w.shape[1]

    # bf16-store the weight; fold the `x*2 - 1` affine into the parameters:
    #   (2x - 1) @ W + b  ==  x @ (2W) + (b - sum(W, axis=0))
    w_eff = w.astype(jnp.bfloat16).astype(jnp.float32)   # effective (rounded) weight
    w_folded = (w_eff * 2.0).astype(jnp.bfloat16)        # exact power-of-2 rescale
    b_folded = (b.astype(jnp.float32) - jnp.sum(w_eff, axis=0)).reshape(1, K)
    alpha_s = alpha.reshape(1).astype(jnp.float32)

    # Batch tiling: sublane-align, one big tile if it fits max_tile_b,
    # otherwise multiple 512-row "parallel" tiles; pad instead of asserting.
    B8 = ((B + 7) // 8) * 8
    tile_b = min(max_tile_b, B8)
    B_pad = ((B8 + tile_b - 1) // tile_b) * tile_b

    x = rgbd.reshape(B, D).astype(jnp.float32)
    if B_pad != B:
        x = jnp.pad(x, ((0, B_pad - B), (0, 0)))

    grid = (B_pad // tile_b,)
    out = pl.pallas_call(
        rgbd_in_kernel,
        out_shape=jax.ShapeDtypeStruct((B_pad, K), jnp.float32),
        grid_spec=pltpu.PrefetchScalarGridSpec(
            num_scalar_prefetch=0,
            grid=grid,
            in_specs=[
                pl.BlockSpec((tile_b, D), lambda i: (i, 0)),        # x tile
                pl.BlockSpec((D, K), lambda i: (0, 0)),             # folded weight (bf16)
                pl.BlockSpec((1, K), lambda i: (0, 0)),             # folded bias
                pl.BlockSpec(memory_space=pltpu.MemorySpace.SMEM),  # prelu alpha
            ],
            out_specs=pl.BlockSpec((tile_b, K), lambda i: (i, 0)),
        ),
        compiler_params=pltpu.CompilerParams(
            dimension_semantics=("parallel",)),
    )(x, w_folded, b_folded, alpha_s)
    return out[:B].reshape(E, S, K)


def reference_forward(rgbd, w, b, alpha):
    """Original-module math in f32: PReLU((rgbd*2-1).flatten(1) @ W + b)."""
    E, S, C, H, W = rgbd.shape
    x = rgbd.reshape(E * S, -1).astype(jnp.float32) * 2.0 - 1.0
    y = x @ w + b[None, :]
    y = jnp.where(y >= 0.0, y, alpha[0] * y)
    return y.reshape(E, S, -1)


if __name__ == "__main__":
    # Small, deterministic config (stand-in for args):
    episodes, steps = 2, 8          # B = 16
    image_size = 16                 # args.image_size
    image_dims = 4                  # RGBD channels
    rgbd_encode_size = 32           # args.rgbd_encode_size

    D = image_dims * image_size * image_size

    key = jax.random.PRNGKey(0)
    k_x, k_w, k_b = jax.random.split(key, 3)

    # Inputs: rgbd in [0, 1] like normalized image data.
    rgbd = jax.random.uniform(
        k_x, (episodes, steps, image_dims, image_size, image_size),
        dtype=jnp.float32)

    # Deterministic parameter init (synthetic; not a checkpoint load).
    w = jax.random.normal(k_w, (D, rgbd_encode_size), dtype=jnp.float32) * 0.02
    b = jax.random.normal(k_b, (rgbd_encode_size,), dtype=jnp.float32) * 0.01
    alpha = jnp.array([0.25], dtype=jnp.float32)   # PReLU default init

    out = rgbd_in_forward(rgbd, w, b, alpha)
    out = jax.block_until_ready(out)

    # The kernel stores the weight in bf16; evaluate the original-module math
    # with the same (bf16-rounded) weight so only accumulation order differs.
    w_eff = w.astype(jnp.bfloat16).astype(jnp.float32)
    ref = reference_forward(rgbd, w_eff, b, alpha)

    assert out.shape == (episodes, steps, rgbd_encode_size)
    assert jnp.allclose(out, ref, atol=1e-4, rtol=1e-4), "mismatch vs reference"

    print("KERNEL_OK")
</pallas_src>

<mosaic_0001>
module attributes {stable_mosaic.version = 11 : i64} {
  func.func @rgbd_in_kernel(%arg0: i32, %arg1: memref<16x1024xf32, #tpu.memory_space<vmem>>, %arg2: memref<1024x32xbf16, #tpu.memory_space<vmem>>, %arg3: memref<1x32xf32, #tpu.memory_space<vmem>>, %arg4: memref<1xf32, #tpu.memory_space<smem>>, %arg5: memref<16x32xf32, #tpu.memory_space<vmem>>) attributes {dimension_semantics = [#tpu.dimension_semantics<parallel>], iteration_bounds = array<i64: 1>, scalar_prefetch = 0 : i64, scratch_operands = 0 : i64, tpu.core_type = #tpu.core_type<tc>, window_params = [{transform_indices = @transform_0, window_bounds = array<i64: 16, 1024>}, {pipeline_mode = #tpu.pipeline_mode<synchronous>, transform_indices = @transform_1, window_bounds = array<i64: 1024, 32>}, {pipeline_mode = #tpu.pipeline_mode<synchronous>, transform_indices = @transform_2, window_bounds = array<i64: 1, 32>}, {transform_indices = @transform_3, window_bounds = array<i64: 1>}, {transform_indices = @transform_4, window_bounds = array<i64: 16, 32>}]} {
    %c0 = arith.constant 0 : index
    %c0_0 = arith.constant 0 : index
    %0 = vector.load %arg1[%c0, %c0_0] : memref<16x1024xf32, #tpu.memory_space<vmem>>, vector<16x1024xf32>
    %c0_1 = arith.constant 0 : index
    %c0_2 = arith.constant 0 : index
    %1 = vector.load %arg2[%c0_1, %c0_2] : memref<1024x32xbf16, #tpu.memory_space<vmem>>, vector<1024x32xbf16>
    %2 = arith.extf %1 : vector<1024x32xbf16> to vector<1024x32xf32>
    %cst = arith.constant dense<0.000000e+00> : vector<16x32xf32>
    %3 = tpu.matmul %0, %2, %cst {dimension_numbers = #tpu.dot_dimension_numbers<[1], [0], [0], [1], [0, 0, 1, 1], [], []>} : vector<16x1024xf32>, vector<1024x32xf32>, vector<16x32xf32> -> vector<16x32xf32>
    %c0_3 = arith.constant 0 : index
    %c0_4 = arith.constant 0 : index
    %4 = vector.load %arg3[%c0_3, %c0_4] : memref<1x32xf32, #tpu.memory_space<vmem>>, vector<1x32xf32>
    %5 = vector.broadcast %4 : vector<1x32xf32> to vector<16x32xf32>
    %6 = arith.addf %3, %5 : vector<16x32xf32>
    %c0_5 = arith.constant 0 : index
    %7 = memref.load %arg4[%c0_5] : memref<1xf32, #tpu.memory_space<smem>>
    %cst_6 = arith.constant 0.000000e+00 : f32
    %8 = vector.broadcast %cst_6 : f32 to vector<16x32xf32>
    %9 = arith.cmpf oge, %6, %8 : vector<16x32xf32>
    %10 = vector.broadcast %7 : f32 to vector<16x32xf32>
    %11 = arith.mulf %10, %6 : vector<16x32xf32>
    %12 = arith.select %9, %6, %11 : vector<16x32xi1>, vector<16x32xf32>
    %c0_7 = arith.constant 0 : index
    %c0_8 = arith.constant 0 : index
    %13 = vector.load %arg5[%c0_7, %c0_8] : memref<16x32xf32, #tpu.memory_space<vmem>>, vector<16x32xf32>
    tpu.vector_store %arg5[%c0_7, %c0_8], %12 {strides = array<i32>} : memref<16x32xf32, #tpu.memory_space<vmem>>, vector<16x32xf32>,
    return
  }
  func.func @transform_0(%arg0: i32) -> (i32, i32) {
    %c0_i32 = arith.constant 0 : i32
    %c0_i32_0 = arith.constant 0 : i32
    return %arg0, %c0_i32 : i32, i32
  }
  func.func @transform_1(%arg0: i32) -> (i32, i32) {
    %c0_i32 = arith.constant 0 : i32
    %c0_i32_0 = arith.constant 0 : i32
    %c0_i32_1 = arith.constant 0 : i32
    return %c0_i32, %c0_i32_0 : i32, i32
  }
  func.func @transform_2(%arg0: i32) -> (i32, i32) {
    %c0_i32 = arith.constant 0 : i32
    %c0_i32_0 = arith.constant 0 : i32
    %c0_i32_1 = arith.constant 0 : i32
    return %c0_i32, %c0_i32_0 : i32, i32
  }
  func.func @transform_3(%arg0: i32) -> i32 {
    %c0_i32 = arith.constant 0 : i32
    %c0_i32_0 = arith.constant 0 : i32
    return %c0_i32 : i32
  }
  func.func @transform_4(%arg0: i32) -> (i32, i32) {
    %c0_i32 = arith.constant 0 : i32
    %c0_i32_0 = arith.constant 0 : i32
    return %arg0, %c0_i32 : i32, i32
  }
}

</mosaic_0001>

<bundles_post_ra>
// kernel: tpu_custom_call.1
= control target key start
LH: loop header
LB: loop body
LE: loop exit
PB: predicated region body
PF: predicated region fallthrough
CT: control target
= control target key end

     0   :  { %s1538_s0 = inlined_call_operand.vmem [shape: f32[16,1024], index: 0, kind: input, shape index: {}]   ;;  %s1539_s1 = inlined_call_operand.vmem [shape: bf16[1024,32], index: 1, kind: input, shape index: {}]   ;;  %s1540_s2 = inlined_call_operand.vmem [shape: f32[1,32], index: 2, kind: input, shape index: {}]   ;;  %s1541_s3 = inlined_call_operand.<no memory space> [shape: f32[1], index: 3, kind: input, shape index: {}]   ;;  %s1542_s4 = inlined_call_operand.hbm [shape: f32[16,32], index: 4, kind: output, shape index: {}]  }
   0x1   :  { %v889_v0 = vld [vmem:[%s1539_s1 + $0x40] sm:$0xff]   ;;  %v890_v4 = vld [vmem:[%s1539_s1 + $0x48] sm:$0xff]   ;;  %v891_v8 = vld [vmem:[%s1539_s1 + $0x50] sm:$0xff]  }
   0x2   :  { %v627_v1 = vld [vmem:[%s1539_s1] sm:$0xff]   ;;  %1098 = vmatprep.subr.bf16.mxu0 %v889_v0  ;;  %v906_v5 = vld [vmem:[%s1539_s1 + $0xc8] sm:$0xff]   ;;  %v907_v9 = vld [vmem:[%s1539_s1 + $0xd0] sm:$0xff]  }
   0x3   :  { %v905_v2 = vld [vmem:[%s1539_s1 + $0xc0] sm:$0xff]   ;;  %1100 = vmatpush3.bf16.msra.mxu0 %v627_v1  ;;  %v882_v6 = vld [vmem:[%s1539_s1 + $0x8] sm:$0xff]   ;;  %v883_v10 = vld [vmem:[%s1539_s1 + $0x10] sm:$0xff]  }
   0x4   :  { %1130 = vmatprep.subr.bf16.mxu1 %v905_v2  ;;  %v897_v3 = vld [vmem:[%s1539_s1 + $0x80] sm:$0xff]   ;;  %1102 = vmatprep.subr.bf16.mxu0 %v890_v4  ;;  %v898_v7 = vld [vmem:[%s1539_s1 + $0x88] sm:$0xff]   ;;  %v899_v11 = vld [vmem:[%s1539_s1 + $0x90] sm:$0xff]  }
   0x5   :  { %1132 = vmatpush3.bf16.msra.mxu1 %v897_v3  ;;  %v892_v12 = vld [vmem:[%s1539_s1 + $0x58] sm:$0xff]   ;;  %v20_v14 = vld [vmem:[%s1538_s0 + $0x8] sm:$0xff]  ;;  %v893_v18 = vld [vmem:[%s1539_s1 + $0x60] sm:$0xff]  }
   0x6   :  { %1134 = vmatprep.subr.bf16.mxu1 %v906_v5  ;;  %v908_v13 = vld [vmem:[%s1539_s1 + $0xd8] sm:$0xff]   ;;  %v909_v19 = vld [vmem:[%s1539_s1 + $0xe0] sm:$0xff]   ;;  %362 = vmatprep.mubr.f32.mxu0 %v20_v14  ;;  %v894_v22 = vld [vmem:[%s1539_s1 + $0x68] sm:$0xff]  }
   0x7   :  { %1104 = vmatpush3.bf16.msra.mxu0 %v882_v6  ;;  %v884_v15 = vld [vmem:[%s1539_s1 + $0x18] sm:$0xff]   ;;  %v885_v20 = vld [vmem:[%s1539_s1 + $0x20] sm:$0xff]   ;;  %v910_v23 = vld [vmem:[%s1539_s1 + $0xe8] sm:$0xff]  }
   0x8   :  { %1106 = vmatprep.subr.bf16.mxu0 %v891_v8  ;;  %v900_v16 = vld [vmem:[%s1539_s1 + $0x98] sm:$0xff]   ;;  %v901_v21 = vld [vmem:[%s1539_s1 + $0xa0] sm:$0xff]   ;;  %v886_v24 = vld [vmem:[%s1539_s1 + $0x28] sm:$0xff]  }
   0x9   :  { %1136 = vmatpush3.bf16.msra.mxu1 %v898_v7  ;;  %v22_v17 = vld [vmem:[%s1538_s0 + $0x18] sm:$0xff]  ;;  %v902_v25 = vld [vmem:[%s1539_s1 + $0xa8] sm:$0xff]   ;;  %v895_v26 = vld [vmem:[%s1539_s1 + $0x70] sm:$0xff]  }
   0xa   :  { %1138 = vmatprep.subr.bf16.mxu1 %v907_v9  ;;  %437 = vmatprep.mubr.f32.mxu1 %v22_v17  ;;  %v911_v27 = vld [vmem:[%s1539_s1 + $0xf0] sm:$0xff]   ;;  %v896_v30 = vld [vmem:[%s1539_s1 + $0x78] sm:$0xff]  }
   0xb   :  { %1108 = vmatpush3.bf16.msra.mxu0 %v883_v10  ;;  %v887_v28 = vld [vmem:[%s1539_s1 + $0x30] sm:$0xff]   ;;  %v912_v31 = vld [vmem:[%s1539_s1 + $0xf8] sm:$0xff]  }
   0xc   :  { %1110 = vmatprep.subr.bf16.mxu0 %v892_v12  ;;  %v903_v29 = vld [vmem:[%s1539_s1 + $0xb0] sm:$0xff]  }
   0xd   :  { %1140 = vmatpush3.bf16.msra.mxu1 %v899_v11 }
   0xe   :  { %1142 = vmatprep.subr.bf16.mxu1 %v908_v13 }
   0xf   :  { %1112 = vmatpush3.bf16.msra.mxu0 %v884_v15 }
  0x10   :  { %1114 = vmatprep.subr.bf16.mxu0 %v893_v18 }
  0x11   :  { %1144 = vmatpush3.bf16.msra.mxu1 %v900_v16 }
  0x12   :  { %1146 = vmatprep.subr.bf16.mxu1 %v909_v19 }
  0x13   :  { %1116 = vmatpush3.bf16.msra.mxu0 %v885_v20 }
  0x14   :  { %1118 = vmatprep.subr.bf16.mxu0 %v894_v22 }
  0x15   :  { %1148 = vmatpush3.bf16.msra.mxu1 %v901_v21 }
  0x16   :  { %1150 = vmatprep.subr.bf16.mxu1 %v910_v23 }
  0x17   :  { %1120 = vmatpush3.bf16.msra.mxu0 %v886_v24 }
  0x18   :  { %1122 = vmatprep.subr.bf16.mxu0 %v895_v26 }
  0x19   :  { %1152 = vmatpush3.bf16.msra.mxu1 %v902_v25 }
  0x1a   :  { %1154 = vmatprep.subr.bf16.mxu1 %v911_v27 }
  0x1b   :  { %1124 = vmatpush3.bf16.msra.mxu0 %v887_v28 }
  0x1d   :  { %1156 = vmatpush3.bf16.msra.mxu1 %v903_v29 }
  0x1e   :  { %10 = vsyncpa [#allocation4], 0  ;;  %1126 = vmatprep.subr.bf16.mxu0 %v896_v30  ;;  %v888_v32 = vld [vmem:[%s1539_s1 + $0x38] sm:$0xff]   ;;  %1158 = vmatprep.subr.bf16.mxu1 %v912_v31  ;;  %v921_v34 = vld [vmem:[%s1539_s1 + $0x140] sm:$0xff]   ;;  %vm606_vm1 = vcmask 261120   ;;  %s1252_s20 = smov [#allocation3]  }
  0x1f   :  { %v904_v33 = vld [vmem:[%s1539_s1 + $0xb8] sm:$0xff]   ;;  %v937_v35 = vld [vmem:[%s1539_s1 + $0x1c0] sm:$0xff]   ;;  %1128 = vmatpush3.bf16.msra.mxu0 %v888_v32  ;;  %v21_v37 = vld [vmem:[%s1538_s0 + $0x10] sm:$0xff]  ;;  %s614_s21 = sshll.u32 %s1252_s20, 4  ;;  %s615_s21 = int_to_ptr.vmem [resolvable:$true] %s614_s21 }
  0x20   :  { %v19_v36 = vld [vmem:[%s1538_s0] sm:$0xff]  ;;  %1162 = vmatprep.subr.bf16.mxu0 %v921_v34  ;;  %v922_v40 = vld [vmem:[%s1539_s1 + $0x148] sm:$0xff]   ;;  %v30_v43 = vld [vmem:[%s1538_s0 + $0x58] sm:$0xff]  ;;  %p1233_p1 = scmp.lt.s32.totalorder %s615_s21, %s615_s21 }
  0x21   :  { %1160 = vmatpush3.bf16.msra.mxu1 %v904_v33  ;;  %v913_v38 = vld [vmem:[%s1539_s1 + $0x100] sm:$0xff]   ;;  %v938_v41 = vld [vmem:[%s1539_s1 + $0x1c8] sm:$0xff]   ;;  %v29_v45 = vld [vmem:[%s1538_s0 + $0x50] sm:$0xff] }
  0x22   :  { %1194 = vmatprep.subr.bf16.mxu1 %v937_v35  ;;  %v929_v39 = vld [vmem:[%s1539_s1 + $0x180] sm:$0xff]   ;;  %363 = vmatmul.mubr.f32.vlgmr.msra.gmra.mrb[0].mxu0 %v19_v36  ;;  %v28_v42 = vld [vmem:[%s1538_s0 + $0x48] sm:$0xff]  ;;  %v923_v48 = vld [vmem:[%s1539_s1 + $0x150] sm:$0xff]  }
  0x23   :  { %1164 = vmatpush3.bf16.msra.mxu0 %v913_v38  ;;  %v27_v44 = vld [vmem:[%s1538_s0 + $0x40] sm:$0xff]  ;;  %v914_v46 = vld [vmem:[%s1539_s1 + $0x108] sm:$0xff]   ;;  %v939_v49 = vld [vmem:[%s1539_s1 + $0x1d0] sm:$0xff]   ;;  %367 = vmatprep.mubr.f32.mxu0 %v28_v42  ;;  %v601_v42 = vstv %s1541_s3  ;;  %s1228_s3 = scalar_lea.vmem %s615_s21, 256 }
  0x24   :  { %438 = vmatmul.mubr.f32.vlgmr.msra.gmra.mrb[0].mxu1 %v21_v37  ;;  %1166 = vmatprep.subr.bf16.mxu0 %v922_v40  ;;  %v930_v47 = vld [vmem:[%s1539_s1 + $0x188] sm:$0xff]   ;;  %v26_v51 = vld [vmem:[%s1538_s0 + $0x38] sm:$0xff]  ;;  %v915_v52 = vld [vmem:[%s1539_s1 + $0x110] sm:$0xff]   ;;  %p1229_p0 = scmp.ne.s32.totalorder %s615_s21, %s1228_s3  ;;  %p1234_p2 = scmp.lt.s32.totalorder %s1228_s3, %s1228_s3 }
  0x25   :  { %1196 = vmatpush3.bf16.msra.mxu1 %v929_v39  ;;  %442 = vmatprep.mubr.f32.mxu1 %v30_v43  ;;  %v24_v50 = vld [vmem:[%s1538_s0 + $0x28] sm:$0xff]  ;;  %v931_v53 = vld [vmem:[%s1539_s1 + $0x190] sm:$0xff]   ;;  %v924_v54 = vld [vmem:[%s1539_s1 + $0x158] sm:$0xff]  }
  0x26   :  { %1198 = vmatprep.subr.bf16.mxu1 %v938_v41  ;;  %368 = vmatmul.mubr.f32.gmra.mrb[2].mxu0 %v27_v44  ;;  %v940_v55 = vld [vmem:[%s1539_s1 + $0x1d8] sm:$0xff]   ;;  %v925_v58 = vld [vmem:[%s1539_s1 + $0x160] sm:$0xff]   ;;  %v926_v62 = vld [vmem:[%s1539_s1 + $0x168] sm:$0xff]   ;;  %p1235_p3 = por %p1234_p2, %p1233_p1 }
  0x27   :  { %1168 = vmatpush3.bf16.msra.mxu0 %v914_v46  ;;  %512 = vmatprep.mubr.f32.mxu0 %v24_v50  ;;  %v916_v56 = vld [vmem:[%s1539_s1 + $0x118] sm:$0xff]   ;;  %v941_v59 = vld [vmem:[%s1539_s1 + $0x1e0] sm:$0xff]   ;;  %v942_v63 = vld [vmem:[%s1539_s1 + $0x1e8] sm:$0xff]  }
  0x28   :  { %443 = vmatmul.mubr.f32.gmra.mrb[2].mxu1 %v29_v45  ;;  %1170 = vmatprep.subr.bf16.mxu0 %v923_v48  ;;  %v932_v57 = vld [vmem:[%s1539_s1 + $0x198] sm:$0xff]   ;;  %v917_v60 = vld [vmem:[%s1539_s1 + $0x120] sm:$0xff]   ;;  %v918_v0 = vld [vmem:[%s1539_s1 + $0x128] sm:$0xff]   ;;  %p1236_p4 = pnand %p1235_p3, %p1229_p0 }
  0x29   :  { %1200 = vmatpush3.bf16.msra.mxu1 %v930_v47  ;;  %587 = vmatprep.mubr.f32.mxu1 %v26_v51  ;;  %v933_v61 = vld [vmem:[%s1539_s1 + $0x1a0] sm:$0xff]   ;;  %v934_v1 = vld [vmem:[%s1539_s1 + $0x1a8] sm:$0xff]   ;;  %v927_v2 = vld [vmem:[%s1539_s1 + $0x170] sm:$0xff]  }
  0x2a   :  { %1202 = vmatprep.subr.bf16.mxu1 %v939_v49  ;;  %v943_v3 = vld [vmem:[%s1539_s1 + $0x1f0] sm:$0xff]   ;;  %v928_v6 = vld [vmem:[%s1539_s1 + $0x178] sm:$0xff]   ;;  %v23_v10 = vld [vmem:[%s1538_s0 + $0x20] sm:$0xff] }
  0x2b   :  { %1172 = vmatpush3.bf16.msra.mxu0 %v915_v52  ;;  %v919_v4 = vld [vmem:[%s1539_s1 + $0x130] sm:$0xff]   ;;  %v944_v7 = vld [vmem:[%s1539_s1 + $0x1f8] sm:$0xff]   ;;  %v32_v12 = vld [vmem:[%s1538_s0 + $0x68] sm:$0xff] }
  0x2c   :  { %1174 = vmatprep.subr.bf16.mxu0 %v924_v54  ;;  %v935_v5 = vld [vmem:[%s1539_s1 + $0x1b0] sm:$0xff]   ;;  %v920_v8 = vld [vmem:[%s1539_s1 + $0x138] sm:$0xff]   ;;  %v31_v14 = vld [vmem:[%s1538_s0 + $0x60] sm:$0xff] }
  0x2d   :  { %1204 = vmatpush3.bf16.msra.mxu1 %v931_v53  ;;  %v936_v9 = vld [vmem:[%s1539_s1 + $0x1b8] sm:$0xff]   ;;  %v25_v11 = vld [vmem:[%s1538_s0 + $0x30] sm:$0xff]  ;;  %v625_v18 = vld [vmem:[%s1540_s2] ss:$0 sm:$0xff] }
  0x2e   :  { %1206 = vmatprep.subr.bf16.mxu1 %v940_v55  ;;  %v34_v13 = vld [vmem:[%s1538_s0 + $0x78] sm:$0xff]  ;;  %v33_v15 = vld [vmem:[%s1538_s0 + $0x70] sm:$0xff] }
  0x2f   :  { %1176 = vmatpush3.bf16.msra.mxu0 %v916_v56 }
  0x30   :  { %1178 = vmatprep.subr.bf16.mxu0 %v925_v58 }
  0x31   :  { %1208 = vmatpush3.bf16.msra.mxu1 %v932_v57 }
  0x32   :  { %1210 = vmatprep.subr.bf16.mxu1 %v941_v59 }
  0x33   :  { %1180 = vmatpush3.bf16.msra.mxu0 %v917_v60 }
  0x34   :  { %1182 = vmatprep.subr.bf16.mxu0 %v926_v62 }
  0x35   :  { %1212 = vmatpush3.bf16.msra.mxu1 %v933_v61 }
  0x36   :  { %1214 = vmatprep.subr.bf16.mxu1 %v942_v63 }
  0x37   :  { %1184 = vmatpush3.bf16.msra.mxu0 %v918_v0 }
  0x38   :  { %1186 = vmatprep.subr.bf16.mxu0 %v927_v2 }
  0x39   :  { %1216 = vmatpush3.bf16.msra.mxu1 %v934_v1 }
  0x3a   :  { %1218 = vmatprep.subr.bf16.mxu1 %v943_v3 }
  0x3b   :  { %1188 = vmatpush3.bf16.msra.mxu0 %v919_v4 }
  0x3c   :  { %1190 = vmatprep.subr.bf16.mxu0 %v928_v6 }
  0x3d   :  { %1220 = vmatpush3.bf16.msra.mxu1 %v935_v5 }
  0x3e   :  { %1222 = vmatprep.subr.bf16.mxu1 %v944_v7 }
  0x3f   :  { %1192 = vmatpush3.bf16.msra.mxu0 %v920_v8 }
  0x41   :  { %1224 = vmatpush3.bf16.msra.mxu1 %v936_v9 }
  0x42   :  { %513 = vmatmul.mubr.f32.vlgmr.msra.gmra.mrb[4].mxu0 %v23_v10 }
  0x43   :  { %517 = vmatprep.mubr.f32.mxu0 %v32_v12 }
  0x44   :  { %588 = vmatmul.mubr.f32.vlgmr.msra.gmra.mrb[4].mxu1 %v25_v11 }
  0x45   :  { %592 = vmatprep.mubr.f32.mxu1 %v34_v13 }
  0x46   :  { %518 = vmatmul.mubr.f32.gmra.mrb[6].mxu0 %v31_v14 }
  0x48   :  { %593 = vmatmul.mubr.f32.gmra.mrb[6].mxu1 %v33_v15 }
  0xf5   :  { %v977_v16 = vpop.f32.mrb[0].mxu0 }
  0xf6   :  { %v978_v19 = vpop.f32.mrb[1].mxu0 }
  0xf7   :  { %v1015_v17 = vpop.f32.mrb[0].mxu1  ;;  %v979_v21 = vadd.f32 %v978_v19, %v977_v16 }
  0xf8   :  { %v1016_v20 = vpop.f32.mrb[1].mxu1 }
  0xf9   :  { %v1017_v22 = vadd.f32 %v1016_v20, %v1015_v17  ;;  %v365_v23 = vadd.f32 %v979_v21, %v625_v18  ;;  %v980_v24 = vpop.f32.mrb[2].mxu0 }
  0xfa   :  { %v981_v26 = vpop.f32.mrb[3].mxu0 }
  0xfb   :  { %v1018_v25 = vpop.f32.mrb[2].mxu1  ;;  %v440_v28 = vadd.f32 %v1017_v22, %v365_v23  ;;  %v982_v29 = vadd.f32 %v981_v26, %v980_v24 }
  0xfc   :  { %v1019_v27 = vpop.f32.mrb[3].mxu1 }
  0xfd   :  { %v1020_v30 = vadd.f32 %v1019_v27, %v1018_v25  ;;  %v370_v31 = vadd.f32 %v982_v29, %v625_v18 }
  0xff   :  { %v445_v32 = vadd.f32 %v1020_v30, %v370_v31 }
 0x115   :  { %v1053_v33 = vpop.f32.mrb[4].mxu0 }
 0x116   :  { %v1054_v35 = vpop.f32.mrb[5].mxu0 }
 0x117   :  { %v1091_v34 = vpop.f32.mrb[4].mxu1  ;;  %v1055_v37 = vadd.f32 %v1054_v35, %v1053_v33 }
 0x118   :  { %v1092_v36 = vpop.f32.mrb[5].mxu1 }
 0x119   :  { %v1093_v38 = vadd.f32 %v1092_v36, %v1091_v34  ;;  %v515_v39 = vadd.f32 %v1055_v37, %v440_v28  ;;  %v1056_v40 = vpop.f32.mrb[6].mxu0 }
 0x11a   :  { %v1057_v43 = vpop.f32.mrb[7].mxu0 }
 0x11b   :  { %v1094_v41 = vpop.f32.mrb[6].mxu1  ;;  %v590_v45 = vadd.f32 %v1093_v38, %v515_v39  ;;  %v1058_v46 = vadd.f32 %v1057_v43, %v1056_v40 }
 0x11c   :  { %v1095_v44 = vpop.f32.mrb[7].mxu1 }
 0x11d   :  { %v1096_v47 = vadd.f32 %v1095_v44, %v1094_v41  ;;  %vm599_vm0 = vcmp.ge.f32.partialorder %v590_v45, 0.0  ;;  %v602_v48 = vmul.f32 %v601_v42, %v590_v45  ;;  %v520_v49 = vadd.f32 %v1058_v46, %v445_v32 }
 0x11f   :  { %v604_v50 = vsel %vm599_vm0, %v590_v45, %v602_v48  ;;  %v595_v51 = vadd.f32 %v1096_v47, %v520_v49 }
 0x120   :  { %607 = vst.msk [vmem:[#allocation3] sm:$0xff] %vm606_vm1, %v604_v50 }
 0x121   :  { %vm600_vm2 = vcmp.ge.f32.partialorder %v595_v51, 0.0  ;;  %v603_v52 = vmul.f32 %v601_v42, %v595_v51 }
 0x123   :  { %v605_v53 = vsel %vm600_vm2, %v595_v51, %v603_v52 }
 0x124   :  { %608 = vst.msk [vmem:[#allocation3 + $0x8] sm:$0xff] %vm606_vm1, %v605_v53 }
 0x125   :  { %1239 = shalt.err (!%p1236_p4)
}
 0x126   :  { %s1240_s24 = scalar_lea.hbm %s1542_s4, 256 }
 0x127   :  { %p1241_p5 = scmp.ne.s32.totalorder %s1542_s4, %s1240_s24  ;;  %p1244_p6 = scmp.lt.u32.totalorder %s1240_s24, %s1542_s4 }
 0x129   :  { %p1246_p7 = pnand %p1244_p6, %p1241_p5 }
 0x12b   :  { %1249 = shalt.err (!%p1246_p7)
}
 0x12c   :  { %s1253_s29 = smov 128   ;;  %s1254_s30 = smov 8  }
 0x12d   :  { %620 = dma.vmem_to_hbm [thread:$0]  %s615_s21, 256, %s1542_s4, [#allocation4], %s1253_s29, %s1253_s29, %s1254_s30  }
 0x12e   :  { %1250 = dma.done.wait [#allocation4], 256  }
 0x12f   :  { %1251 = vsyncadd [#allocation4], 4294967040 }
 0x130   :  { %624 = vsyncpa [#allocation4], 1 }

</bundles_post_ra>
